<compile_context>
chip_gen: v7x
topology: tpu7x:2x2x1
jax: 0.10.0
libtpu: 0.0.40
codegen_flags: <defaults>
</compile_context>

<pallas_src>
import math

import jax
import jax.numpy as jnp
from jax.experimental import pallas as pl
from jax.experimental.pallas import tpu as pltpu


# ---------------------------------------------------------------------------
# Small helpers
# ---------------------------------------------------------------------------
def _round_up(v, m):
    return ((v + m - 1) // m) * m


def _as_f32(a):
    return a if a.dtype == jnp.float32 else a.astype(jnp.float32)


def _pad2(arr, rows, cols):
    r, c = arr.shape
    if r == rows and c == cols:          # skip the pad copy when already aligned
        return arr
    return jnp.pad(arr, ((0, rows - r), (0, cols - c)))


def _vmem_limit_bytes():
    """Generation-aware VMEM budget: ~55% of physical VMEM per TensorCore."""
    cap = 64 * 1024 * 1024               # conservative fallback (v7x per-TC size)
    try:
        info = pltpu.get_tpu_info()
        cap = getattr(info, "vmem_capacity_bytes", cap) or cap
    except Exception:
        pass
    return int(cap * 0.55)               # ~70 MiB on v5e/v6e, ~35 MiB on v7x


_TM_CANDIDATES = (1024, 512, 256, 128, 64, 32, 16)
_TN_CANDIDATES = (512, 256, 128)
# ~peak-flops / HBM-bandwidth (flop/byte) on v6e/v7x; trades batch-padding waste
# against per-batch-tile w_n HBM re-reads in the tm selection score.
_ROOFLINE_FLOPS_PER_BYTE = 512


def _pick_tile(size, candidates):
    """Minimize padded extent; ties go to the larger tile."""
    best_pad, best_c = None, None
    for c in candidates:
        p = _round_up(max(size, 1), c)
        if best_pad is None or p < best_pad or (p == best_pad and c > best_c):
            best_pad, best_c = p, c
    return best_c


def _derive_geometry(in_dim, out_dim):
    """Padded dims + tiles that depend only on the weight shape (cacheable)."""
    d_pad = _round_up(in_dim, 256)                       # K multiple of 256
    if d_pad <= 2048:
        tk = d_pad                                       # single K block: x read once
    else:
        tk = next(t for t in (2048, 1024, 512, 256) if d_pad % t == 0)
    tn = _pick_tile(out_dim, _TN_CANDIDATES)             # lane-dense output tile
    o_pad = _round_up(out_dim, tn)
    tn1 = 128                                            # stage-1 out_dim tile (f32 rows)
    return d_pad, tk, o_pad, tn, tn1


def _stage2_vmem_bytes(tm, tn, tk, out_itemsize):
    return (2 * tm * tk * 2            # x_n tiles, bf16, double-buffered
            + 2 * tn * tk * 2          # w_n tiles
            + 2 * tm * tn * out_itemsize   # output tiles
            + tm * tn * 4)             # f32 accumulator scratch


def _pick_tm(N, tn, tk, budget, out_itemsize):
    feasible = [c for c in _TM_CANDIDATES
                if _stage2_vmem_bytes(c, tn, tk, out_itemsize) <= budget] or [16]
    best, best_score = None, None
    for c in feasible:
        n_pad = _round_up(N, c)
        score = n_pad * (1.0 + _ROOFLINE_FLOPS_PER_BYTE / c)
        if best_score is None or score < best_score or (score == best_score and c > best):
            best, best_score = c, score
    return best


def _pick_tm0(n_pad, d_pad, budget):
    """Stage-0 batch tile: largest power of two dividing n_pad that fits VMEM."""
    tm0 = 512
    while tm0 > 8 and (12 * tm0 * d_pad > budget or n_pad % tm0 != 0):
        tm0 //= 2
    return tm0


# ---------------------------------------------------------------------------
# Stage 0: x_n = scale * x / max(||x||, 1e-12)   (once per call, bf16 output)
# ---------------------------------------------------------------------------
def _prenorm_x_kernel(scale_ref, x_ref, xn_ref):
    x = x_ref[...]
    sumsq = jnp.sum(x * x, axis=1, keepdims=True)
    # 1 / max(||x||, eps) == rsqrt(max(sum(x^2), eps^2)); matches F.normalize(eps=1e-12).
    # `scale` folded in here so the main matmul has no scalar operand / scaling pass.
    inv = scale_ref[0, 0] * jax.lax.rsqrt(jnp.maximum(sumsq, 1e-24))
    xn_ref[...] = (x * inv).astype(xn_ref.dtype)


# ---------------------------------------------------------------------------
# Stage 1a: inv = rsqrt(max(||weight + B@A||^2, eps^2))   (K-tiled reduction)
# ---------------------------------------------------------------------------
def _w_inv_kernel(w_ref, b_ref, a_ref, inv_ref, acc_ref):
    k = pl.program_id(1)

    @pl.when(k == 0)
    def _():
        acc_ref[...] = jnp.zeros_like(acc_ref)

    w_eff = w_ref[...] + jnp.dot(b_ref[...], a_ref[...],
                                 preferred_element_type=jnp.float32)
    acc_ref[...] += jnp.sum(w_eff * w_eff, axis=1, keepdims=True)

    @pl.when(k == pl.num_programs(1) - 1)
    def _():
        inv_ref[...] = jax.lax.rsqrt(jnp.maximum(acc_ref[...], 1e-24))


# ---------------------------------------------------------------------------
# Stage 1b: w_n = (weight + B@A) * inv   (K-tiled, bf16 output)
# ---------------------------------------------------------------------------
def _w_norm_kernel(w_ref, b_ref, a_ref, inv_ref, wn_ref):
    w_eff = w_ref[...] + jnp.dot(b_ref[...], a_ref[...],
                                 preferred_element_type=jnp.float32)
    wn_ref[...] = (w_eff * inv_ref[...]).astype(wn_ref.dtype)


# ---------------------------------------------------------------------------
# Stage 2: logits = x_n @ w_n.T   (pure bf16 matmul, f32 accumulation over K)
# ---------------------------------------------------------------------------
def _cosine_matmul_kernel(xn_ref, wn_ref, out_ref, acc_ref):
    @pl.when(pl.program_id(2) == 0)
    def _():
        acc_ref[...] = jnp.zeros_like(acc_ref)

    # Contract dim 1 of both operands -> no transposed copy of w_n.
    acc_ref[...] += jax.lax.dot_general(
        xn_ref[...], wn_ref[...],
        dimension_numbers=(((1,), (1,)), ((), ())),
        preferred_element_type=jnp.float32)

    @pl.when(pl.program_id(2) == pl.num_programs(2) - 1)
    def _():
        out_ref[...] = acc_ref[...].astype(out_ref.dtype)


# ---------------------------------------------------------------------------
# Wrappers
# ---------------------------------------------------------------------------
def prepare_cosine_weight(weight, A, B, *, compute_dtype=jnp.bfloat16):
    """Stage 1: normalized effective weight (padded, bf16).

    Cache the result across forward calls whenever weight/A/B are unchanged
    (inference): it removes the LoRA matmul, the row-norm, and the weight
    padding from the per-batch path.
    """
    out_dim, in_dim = weight.shape
    r = A.shape[0]
    d_pad, tk, o_pad, _, tn1 = _derive_geometry(in_dim, out_dim)
    r_pad = _round_up(r, 256)

    w_p = _pad2(_as_f32(weight), o_pad, d_pad)
    a_p = _pad2(_as_f32(A), r_pad, d_pad)
    b_p = _pad2(_as_f32(B), o_pad, r_pad)

    vmem_limit = _vmem_limit_bytes()
    grid = (o_pad // tn1, d_pad // tk)

    # -- Stage 1a: per-row inverse L2 norm (accumulator pattern over K) ------
    inv = pl.pallas_call(
        _w_inv_kernel,
        out_shape=jax.ShapeDtypeStruct((o_pad, 1), jnp.float32),
        grid_spec=pltpu.PrefetchScalarGridSpec(
            num_scalar_prefetch=0,
            grid=grid,
            in_specs=[
                pl.BlockSpec((tn1, tk), lambda j, k: (j, k)),     # weight tile
                pl.BlockSpec((tn1, r_pad), lambda j, k: (j, 0)),  # B tile (resident in k)
                pl.BlockSpec((r_pad, tk), lambda j, k: (0, k)),   # A tile
            ],
            out_specs=pl.BlockSpec((tn1, 1), lambda j, k: (j, 0)),
            scratch_shapes=[pltpu.VMEM((tn1, 1), jnp.float32)],
        ),
        compiler_params=pltpu.CompilerParams(
            dimension_semantics=("parallel", "arbitrary"),
            vmem_limit_bytes=vmem_limit,
        ),
    )(w_p, b_p, a_p)

    # -- Stage 1b: scale rows and emit bf16 w_n (VMEM flat in in_dim) --------
    w_n = pl.pallas_call(
        _w_norm_kernel,
        out_shape=jax.ShapeDtypeStruct((o_pad, d_pad), compute_dtype),
        grid_spec=pltpu.PrefetchScalarGridSpec(
            num_scalar_prefetch=0,
            grid=grid,
            in_specs=[
                pl.BlockSpec((tn1, tk), lambda j, k: (j, k)),
                pl.BlockSpec((tn1, r_pad), lambda j, k: (j, 0)),
                pl.BlockSpec((r_pad, tk), lambda j, k: (0, k)),
                pl.BlockSpec((tn1, 1), lambda j, k: (j, 0)),
            ],
            out_specs=pl.BlockSpec((tn1, tk), lambda j, k: (j, k)),
        ),
        compiler_params=pltpu.CompilerParams(
            dimension_semantics=("parallel", "parallel"),
            vmem_limit_bytes=vmem_limit,
        ),
    )(w_p, b_p, a_p, inv)
    return w_n


def semantic_cosine_linear(x, weight, A, B, scale, bias=None, *, w_n=None,
                           compute_dtype=jnp.bfloat16, out_dtype=jnp.float32):
    """x: (N, in_dim), weight: (out_dim, in_dim), A: (r, in_dim), B: (out_dim, r).

    `w_n`: optional pre-computed output of prepare_cosine_weight() (amortizes
    stage 1 + weight padding across calls). `out_dtype=jnp.bfloat16` halves the
    logits HBM writeback if the consumer tolerates it.
    """
    N, in_dim = x.shape
    out_dim = weight.shape[0]
    d_pad, tk, o_pad, tn, _ = _derive_geometry(in_dim, out_dim)
    k_steps = d_pad // tk

    vmem_limit = _vmem_limit_bytes()
    budget = int(vmem_limit * 0.7)       # headroom for compiler-internal scratch

    if w_n is None:
        w_n = prepare_cosine_weight(weight, A, B, compute_dtype=compute_dtype)
    assert w_n.shape == (o_pad, d_pad), "w_n must come from prepare_cosine_weight()"

    # Roofline-aware batch tile; n_pad multiple of tm.
    tm = _pick_tm(N, tn, tk, budget, jnp.dtype(out_dtype).itemsize)
    n_pad = _round_up(N, tm)

    # --- Stage 0: pre-normalize x once (f32 math, bf16 output, scale folded) ---
    # Needs the full row per tile to compute the norm -> in_dim untiled here;
    # tm0 shrinks with in_dim to stay inside the VMEM budget.
    x_p = _pad2(_as_f32(x), n_pad, d_pad)
    scale_arr = jnp.asarray(scale, jnp.float32).reshape(1, 1)
    tm0 = _pick_tm0(n_pad, d_pad, budget)
    x_n = pl.pallas_call(
        _prenorm_x_kernel,
        out_shape=jax.ShapeDtypeStruct((n_pad, d_pad), compute_dtype),
        grid_spec=pltpu.PrefetchScalarGridSpec(
            num_scalar_prefetch=0,
            grid=(n_pad // tm0,),
            in_specs=[
                pl.BlockSpec(memory_space=pltpu.MemorySpace.SMEM),   # scale (1,1)
                pl.BlockSpec((tm0, d_pad), lambda i: (i, 0)),
            ],
            out_specs=pl.BlockSpec((tm0, d_pad), lambda i: (i, 0)),
        ),
        compiler_params=pltpu.CompilerParams(
            dimension_semantics=("parallel",),
            vmem_limit_bytes=vmem_limit,
        ),
    )(scale_arr, x_p)

    # --- Stage 2: tiled bf16 matmul with f32 accumulation over K ---------------
    # Small-batch, many streamed w_n tiles: deepen the w_n pipeline to hide the
    # per-step DMA latency (+~0.35us/step overhead).
    if tm <= 64 and (o_pad // tn) * k_steps >= 3:
        wn_spec = pl.BlockSpec((tn, tk), lambda i, j, k: (j, k),
                               pipeline_mode=pl.Buffered(3))
    else:
        wn_spec = pl.BlockSpec((tn, tk), lambda i, j, k: (j, k))

    logits_p = pl.pallas_call(
        _cosine_matmul_kernel,
        out_shape=jax.ShapeDtypeStruct((n_pad, o_pad), out_dtype),
        grid_spec=pltpu.PrefetchScalarGridSpec(
            num_scalar_prefetch=0,
            grid=(n_pad // tm, o_pad // tn, k_steps),
            in_specs=[
                pl.BlockSpec((tm, tk), lambda i, j, k: (i, k)),   # x_n tile
                wn_spec,                                          # w_n tile
            ],
            out_specs=pl.BlockSpec((tm, tn), lambda i, j, k: (i, j)),
            scratch_shapes=[pltpu.VMEM((tm, tn), jnp.float32)],
        ),
        compiler_params=pltpu.CompilerParams(
            dimension_semantics=("parallel", "parallel", "arbitrary"),
            vmem_limit_bytes=vmem_limit,
        ),
    )(x_n, w_n)

    logits = logits_p[:N, :out_dim]
    if bias is not None:  # module default is bias=False; trivial add if present
        logits = logits.astype(jnp.float32) + bias.astype(jnp.float32)
    return {"logits": logits}


# ---------------------------------------------------------------------------
# Reference + self-test
# ---------------------------------------------------------------------------
def _reference(x, weight, A, B, scale):
    w_eff = weight + B @ A
    x_n = x / jnp.maximum(jnp.linalg.norm(x, axis=1, keepdims=True), 1e-12)
    w_n = w_eff / jnp.maximum(jnp.linalg.norm(w_eff, axis=1, keepdims=True), 1e-12)
    return scale * (x_n @ w_n.T)


if __name__ == "__main__":
    # Small shapes consistent with the module: batch=8, in_dim=32, out_dim=16, r=4.
    N, in_dim, out_dim, r = 8, 32, 16, 4

    key = jax.random.PRNGKey(0)
    kx, kw, ka, kb = jax.random.split(key, 4)

    bound = 1.0 / math.sqrt(in_dim)  # kaiming_uniform_(a=sqrt(5)) bound
    weight = jax.random.uniform(
        kw, (out_dim, in_dim), jnp.float32, minval=-bound, maxval=bound
    )
    A = jax.random.uniform(
        ka, (r, in_dim), jnp.float32, minval=-bound, maxval=bound
    )
    # Module inits B to zeros; use small non-zero B here to exercise the LoRA path.
    B = 0.1 * jax.random.normal(kb, (out_dim, r), jnp.float32)
    scale = jnp.float32(10.0)
    x = jax.random.normal(kx, (N, in_dim), jnp.float32)

    # Weight-prep (stage 1) is computed once and reused -- cacheable across batches.
    w_n = prepare_cosine_weight(weight, A, B)
    out = semantic_cosine_linear(x, weight, A, B, scale, w_n=w_n)
    logits = jax.block_until_ready(out["logits"])

    ref = _reference(x, weight, A, B, scale)
    assert logits.shape == (N, out_dim)
    # bf16 MXU operands with f32 accumulation -> tolerance relaxed accordingly.
    max_err = jnp.max(jnp.abs(logits - ref))
    assert jnp.allclose(logits, ref, atol=1e-1, rtol=1e-2), (
        f"mismatch vs reference, max abs err = {max_err}"
    )

    print("KERNEL_OK")
</pallas_src>

<mosaic_0001>
module attributes {stable_mosaic.version = 11 : i64} {
  func.func @_w_inv_kernel(%arg0: i32, %arg1: i32, %arg2: memref<128x256xf32, #tpu.memory_space<vmem>>, %arg3: memref<128x256xf32, #tpu.memory_space<vmem>>, %arg4: memref<256x256xf32, #tpu.memory_space<vmem>>, %arg5: memref<128x1xf32, #tpu.memory_space<vmem>>, %arg6: memref<128x1xf32, #tpu.memory_space<vmem>>) attributes {dimension_semantics = [#tpu.dimension_semantics<parallel>, #tpu.dimension_semantics<arbitrary>], iteration_bounds = array<i64: 1, 1>, scalar_prefetch = 0 : i64, scratch_operands = 1 : i64, tpu.core_type = #tpu.core_type<tc>, window_params = [{transform_indices = @transform_0, window_bounds = array<i64: 128, 256>}, {transform_indices = @transform_1, window_bounds = array<i64: 128, 256>}, {transform_indices = @transform_2, window_bounds = array<i64: 256, 256>}, {transform_indices = @transform_3, window_bounds = array<i64: 128, 1>}]} {
    %c0_i32 = arith.constant 0 : i32
    %0 = arith.cmpi eq, %arg1, %c0_i32 : i32
    %1 = arith.extui %0 : i1 to i32
    %c0_i32_0 = arith.constant 0 : i32
    %2 = arith.cmpi ne, %1, %c0_i32_0 : i32
    scf.if %2 {
      %cst_13 = arith.constant 0.000000e+00 : f32
      %17 = vector.broadcast %cst_13 : f32 to vector<128x1xf32>
      %c0_14 = arith.constant 0 : index
      %c0_15 = arith.constant 0 : index
      %18 = vector.load %arg6[%c0_14, %c0_15] : memref<128x1xf32, #tpu.memory_space<vmem>>, vector<128x1xf32>
      tpu.vector_store %arg6[%c0_14, %c0_15], %17 {strides = array<i32>} : memref<128x1xf32, #tpu.memory_space<vmem>>, vector<128x1xf32>,
    } else {
    }
    %c0 = arith.constant 0 : index
    %c0_1 = arith.constant 0 : index
    %3 = vector.load %arg2[%c0, %c0_1] : memref<128x256xf32, #tpu.memory_space<vmem>>, vector<128x256xf32>
    %c0_2 = arith.constant 0 : index
    %c0_3 = arith.constant 0 : index
    %4 = vector.load %arg3[%c0_2, %c0_3] : memref<128x256xf32, #tpu.memory_space<vmem>>, vector<128x256xf32>
    %c0_4 = arith.constant 0 : index
    %c0_5 = arith.constant 0 : index
    %5 = vector.load %arg4[%c0_4, %c0_5] : memref<256x256xf32, #tpu.memory_space<vmem>>, vector<256x256xf32>
    %cst = arith.constant dense<0.000000e+00> : vector<128x256xf32>
    %6 = tpu.matmul %4, %5, %cst {dimension_numbers = #tpu.dot_dimension_numbers<[1], [0], [0], [1], [0, 0, 1, 1], [], []>} : vector<128x256xf32>, vector<256x256xf32>, vector<128x256xf32> -> vector<128x256xf32>
    %7 = arith.addf %3, %6 : vector<128x256xf32>
    %c0_6 = arith.constant 0 : index
    %c0_7 = arith.constant 0 : index
    %8 = vector.load %arg6[%c0_6, %c0_7] : memref<128x1xf32, #tpu.memory_space<vmem>>, vector<128x1xf32>
    %9 = arith.mulf %7, %7 : vector<128x256xf32>
    %cst_8 = arith.constant dense<0.000000e+00> : vector<128xf32>
    %10 = vector.multi_reduction <add>, %9, %cst_8 [1] : vector<128x256xf32> to vector<128xf32>
    %11 = vector.shape_cast %10 : vector<128xf32> to vector<128x1xf32>
    %12 = arith.addf %8, %11 : vector<128x1xf32>
    %c0_9 = arith.constant 0 : index
    %c0_10 = arith.constant 0 : index
    %13 = vector.load %arg6[%c0_9, %c0_10] : memref<128x1xf32, #tpu.memory_space<vmem>>, vector<128x1xf32>
    tpu.vector_store %arg6[%c0_9, %c0_10], %12 {strides = array<i32>} : memref<128x1xf32, #tpu.memory_space<vmem>>, vector<128x1xf32>,
    %c0_i32_11 = arith.constant 0 : i32
    %14 = arith.cmpi eq, %arg1, %c0_i32_11 : i32
    %15 = arith.extui %14 : i1 to i32
    %c0_i32_12 = arith.constant 0 : i32
    %16 = arith.cmpi ne, %15, %c0_i32_12 : i32
    scf.if %16 {
      %c0_13 = arith.constant 0 : index
      %c0_14 = arith.constant 0 : index
      %17 = vector.load %arg6[%c0_13, %c0_14] : memref<128x1xf32, #tpu.memory_space<vmem>>, vector<128x1xf32>
      %cst_15 = arith.constant 1.000000e-24 : f32
      %18 = vector.broadcast %cst_15 : f32 to vector<128x1xf32>
      %19 = arith.maximumf %17, %18 : vector<128x1xf32>
      %20 = math.rsqrt %19 : vector<128x1xf32>
      %c0_16 = arith.constant 0 : index
      %c0_17 = arith.constant 0 : index
      %21 = vector.load %arg5[%c0_16, %c0_17] : memref<128x1xf32, #tpu.memory_space<vmem>>, vector<128x1xf32>
      tpu.vector_store %arg5[%c0_16, %c0_17], %20 {strides = array<i32>} : memref<128x1xf32, #tpu.memory_space<vmem>>, vector<128x1xf32>,
    } else {
    }
    return
  }
  func.func @transform_0(%arg0: i32, %arg1: i32) -> (i32, i32) {
    %c0_i32 = arith.constant 0 : i32
    return %arg0, %arg1 : i32, i32
  }
  func.func @transform_1(%arg0: i32, %arg1: i32) -> (i32, i32) {
    %c0_i32 = arith.constant 0 : i32
    %c0_i32_0 = arith.constant 0 : i32
    return %arg0, %c0_i32 : i32, i32
  }
  func.func @transform_2(%arg0: i32, %arg1: i32) -> (i32, i32) {
    %c0_i32 = arith.constant 0 : i32
    %c0_i32_0 = arith.constant 0 : i32
    return %c0_i32, %arg1 : i32, i32
  }
  func.func @transform_3(%arg0: i32, %arg1: i32) -> (i32, i32) {
    %c0_i32 = arith.constant 0 : i32
    %c0_i32_0 = arith.constant 0 : i32
    return %arg0, %c0_i32 : i32, i32
  }
}

</mosaic_0001>

<bundles_post_ra>
// kernel: tpu_custom_call.1
= control target key start
LH: loop header
LB: loop body
LE: loop exit
PB: predicated region body
PF: predicated region fallthrough
CT: control target
= control target key end

     0   :  { %8 = vsyncpa [#allocation4], 0  ;;  %s977_s0 = inlined_call_operand.hbm [shape: f32[128,256], index: 0, kind: input, shape index: {}]   ;;  %s978_s1 = inlined_call_operand.hbm [shape: f32[128,256], index: 1, kind: input, shape index: {}]   ;;  %s979_s2 = inlined_call_operand.hbm [shape: f32[256,256], index: 2, kind: input, shape index: {}]   ;;  %s980_s3 = inlined_call_operand.vmem [shape: f32[128,1], index: 3, kind: output, shape index: {}]  }
   0x1   :  { %9 = vsyncpa [#allocation6], 0  ;;  %s803_s12 = smov [#allocation5]   ;;  %s804_s14 = smov [#allocation3]  }
   0x2   :  { %s27_s13 = sshll.u32 %s803_s12, 4  ;;  %s15_s15 = sshll.u32 %s804_s14, 4  ;;  %s28_s13 = int_to_ptr.vmem [resolvable:$true] %s27_s13  ;;  %s829_s15 = int_to_ptr.vmem [resolvable:$true] %s15_s15 }
   0x3   :  { %s733_s18 = scalar_lea.hbm %s978_s1, 4096 }
   0x4   :  { %p734_p0 = scmp.ne.s32.totalorder %s978_s1, %s733_s18  ;;  %p737_p1 = scmp.lt.u32.totalorder %s733_s18, %s978_s1 }
   0x6   :  { %p739_p2 = pnand %p737_p1, %p734_p0 }
   0x8   :  { %742 = shalt.err (!%p739_p2)
}
   0x9   :  { %s743_s23 = scalar_lea.vmem %s28_s13, 4096  ;;  %p748_p4 = scmp.lt.s32.totalorder %s28_s13, %s28_s13 }
   0xa   :  { %p744_p3 = scmp.ne.s32.totalorder %s28_s13, %s743_s23  ;;  %p749_p5 = scmp.lt.s32.totalorder %s743_s23, %s743_s23 }
   0xc   :  { %p750_p6 = por %p749_p5, %p748_p4 }
   0xe   :  { %p751_p7 = pnand %p750_p6, %p744_p3 }
  0x10   :  { %754 = shalt.err (!%p751_p7)
}
  0x11   :  { %s805_s24 = smov 256   ;;  %s806_s25 = smov 16  }
  0x12   :  { %33 = dma.hbm_to_vmem [thread:$0]  %s978_s1, 4096, %s28_s13, [#allocation6], %s805_s24, %s805_s24, %s806_s25  }
  0x13   :  { %s755_s30 = scalar_lea.hbm %s977_s0, 4096 }
  0x14   :  { %p756_p8 = scmp.ne.s32.totalorder %s977_s0, %s755_s30  ;;  %p759_p9 = scmp.lt.u32.totalorder %s755_s30, %s977_s0 }
  0x16   :  { %p761_p10 = pnand %p759_p9, %p756_p8 }
  0x18   :  { %764 = shalt.err (!%p761_p10)
}
  0x19   :  { %s765_s8 = scalar_lea.vmem %s829_s15, 4096  ;;  %p770_p12 = scmp.lt.s32.totalorder %s829_s15, %s829_s15 }
  0x1a   :  { %p766_p11 = scmp.ne.s32.totalorder %s829_s15, %s765_s8  ;;  %p771_p13 = scmp.lt.s32.totalorder %s765_s8, %s765_s8 }
  0x1c   :  { %p772_p0 = por %p771_p13, %p770_p12 }
  0x1e   :  { %p773_p1 = pnand %p772_p0, %p766_p11 }
  0x20   :  { %776 = shalt.err (!%p773_p1)
}
  0x21   :  { %21 = dma.hbm_to_vmem [thread:$0]  %s977_s0, 4096, %s829_s15, [#allocation4], %s805_s24, %s805_s24, %s806_s25  }
  0x22   :  { %s807_s10 = smov [#allocation7]   ;;  %s777_s14 = scalar_lea.hbm %s979_s2, 8192 }
  0x23   :  { %s39_s11 = sshll.u32 %s807_s10, 4  ;;  %p778_p2 = scmp.ne.s32.totalorder %s979_s2, %s777_s14  ;;  %s40_s11 = int_to_ptr.vmem [resolvable:$true] %s39_s11 }
  0x24   :  { %p781_p3 = scmp.lt.u32.totalorder %s777_s14, %s979_s2 }
  0x26   :  { %p783_p4 = pnand %p781_p3, %p778_p2 }
  0x28   :  { %786 = shalt.err (!%p783_p4)
}
  0x29   :  { %s787_s20 = scalar_lea.vmem %s40_s11, 8192  ;;  %p792_p6 = scmp.lt.s32.totalorder %s40_s11, %s40_s11 }
  0x2a   :  { %p788_p5 = scmp.ne.s32.totalorder %s40_s11, %s787_s20  ;;  %p793_p7 = scmp.lt.s32.totalorder %s787_s20, %s787_s20 }
  0x2c   :  { %p794_p8 = por %p793_p7, %p792_p6 }
  0x2e   :  { %p795_p9 = pnand %p794_p8, %p788_p5 }
  0x30   :  { %798 = shalt.err (!%p795_p9)
}
  0x31   :  { %45 = dma.hbm_to_vmem [thread:$0]  %s979_s2, 8192, %s40_s11, [#allocation6], %s805_s24, %s805_s24, %s806_s25  }
  0x32   :  { %799 = dma.done.wait [#allocation4], 4096  }
  0x33   :  { %800 = vsyncadd [#allocation4], 4294963200 }
  0x34   :  { %801 = dma.done.wait [#allocation6], 12288  }
  0x35   :  { %802 = vsyncadd [#allocation6], 4294955008  ;;  %v141_v0 = vld [vmem:[#allocation7 + $0x8] sm:$0xff]  ;;  %v143_v1 = vld [vmem:[#allocation7 + $0x18] sm:$0xff]  ;;  %vm59_vm0 = vcmask 7168  }
  0x36   :  { %v140_v2 = vld [vmem:[#allocation7] sm:$0xff]  ;;  %v599_v3 = vpack.c.bf16 %v143_v1, %v141_v0  ;;  %v142_v4 = vld [vmem:[#allocation7 + $0x10] sm:$0xff]  ;;  %v145_v5 = vld [vmem:[#allocation7 + $0x28] sm:$0xff] }
  0x37   :  { %v147_v6 = vld [vmem:[#allocation7 + $0x38] sm:$0xff]  ;;  %v601_v7 = vpack.c.bf16 %v142_v4, %v140_v2  ;;  %v144_v9 = vld [vmem:[#allocation7 + $0x20] sm:$0xff]  ;;  %v146_v10 = vld [vmem:[#allocation7 + $0x30] sm:$0xff] }
  0x38   :  { %v603_v8 = vpack.c.bf16 %v147_v6, %v145_v5  ;;  %v149_v11 = vld [vmem:[#allocation7 + $0x48] sm:$0xff]  ;;  %600 = vmatprep.subr.bf16.mxu0 %v599_v3  ;;  %663 = vmatprep.subr.bf16.mxu1 %v599_v3  ;;  %v151_v12 = vld [vmem:[#allocation7 + $0x58] sm:$0xff]  ;;  %v605_v13 = vpack.c.bf16 %v146_v10, %v144_v9  ;;  %v148_v15 = vld [vmem:[#allocation7 + $0x40] sm:$0xff] }
  0x39   :  { %602 = vmatpush1.bf16.msra.mxu0 %v601_v7  ;;  %679 = vmatpush1.bf16.msra.mxu1 %v601_v7  ;;  %v607_v14 = vpack.c.bf16 %v151_v12, %v149_v11  ;;  %v150_v16 = vld [vmem:[#allocation7 + $0x50] sm:$0xff]  ;;  %v153_v17 = vld [vmem:[#allocation7 + $0x68] sm:$0xff]  ;;  %v155_v18 = vld [vmem:[#allocation7 + $0x78] sm:$0xff] }
  0x3a   :  { %604 = vmatprep.subr.bf16.mxu0 %v603_v8  ;;  %664 = vmatprep.subr.bf16.mxu1 %v603_v8  ;;  %v609_v19 = vpack.c.bf16 %v150_v16, %v148_v15  ;;  %v611_v20 = vpack.c.bf16 %v155_v18, %v153_v17  ;;  %v152_v21 = vld [vmem:[#allocation7 + $0x60] sm:$0xff]  ;;  %v154_v22 = vld [vmem:[#allocation7 + $0x70] sm:$0xff]  ;;  %v157_v23 = vld [vmem:[#allocation7 + $0x88] sm:$0xff] }
  0x3b   :  { %v159_v24 = vld [vmem:[#allocation7 + $0x98] sm:$0xff]  ;;  %v613_v25 = vpack.c.bf16 %v154_v22, %v152_v21  ;;  %v156_v27 = vld [vmem:[#allocation7 + $0x80] sm:$0xff]  ;;  %v158_v28 = vld [vmem:[#allocation7 + $0x90] sm:$0xff] }
  0x3c   :  { %v615_v26 = vpack.c.bf16 %v159_v24, %v157_v23  ;;  %v161_v29 = vld [vmem:[#allocation7 + $0xa8] sm:$0xff]  ;;  %v163_v30 = vld [vmem:[#allocation7 + $0xb8] sm:$0xff]  ;;  %v617_v31 = vpack.c.bf16 %v158_v28, %v156_v27  ;;  %v160_v33 = vld [vmem:[#allocation7 + $0xa0] sm:$0xff] }
  0x3d   :  { %606 = vmatpush1.bf16.msra.mxu0 %v605_v13  ;;  %680 = vmatpush1.bf16.msra.mxu1 %v605_v13  ;;  %v619_v32 = vpack.c.bf16 %v163_v30, %v161_v29  ;;  %v162_v34 = vld [vmem:[#allocation7 + $0xb0] sm:$0xff]  ;;  %v165_v35 = vld [vmem:[#allocation7 + $0xc8] sm:$0xff]  ;;  %v167_v36 = vld [vmem:[#allocation7 + $0xd8] sm:$0xff] }
  0x3e   :  { %608 = vmatprep.subr.bf16.mxu0 %v607_v14  ;;  %665 = vmatprep.subr.bf16.mxu1 %v607_v14  ;;  %v621_v37 = vpack.c.bf16 %v162_v34, %v160_v33  ;;  %v164_v38 = vld [vmem:[#allocation7 + $0xc0] sm:$0xff]  ;;  %v623_v39 = vpack.c.bf16 %v167_v36, %v165_v35  ;;  %v166_v40 = vld [vmem:[#allocation7 + $0xd0] sm:$0xff]  ;;  %v109_v41 = vld [vmem:[#allocation5 + $0x8] sm:$0xff] }
  0x3f   :  { %v125_v42 = vld [vmem:[#allocation5 + $0x88] sm:$0xff]  ;;  %v171_v44 = vld [vmem:[#allocation7 + $0xf8] sm:$0xff]  ;;  %268 = vmatprep.mubr.f32.mxu0 %v109_v41  ;;  %v625_v45 = vpack.c.bf16 %v166_v40, %v164_v38  ;;  %v168_v47 = vld [vmem:[#allocation7 + $0xe0] sm:$0xff] }
  0x40   :  { %v169_v43 = vld [vmem:[#allocation7 + $0xe8] sm:$0xff]  ;;  %316 = vmatprep.mubr.f32.mxu1 %v125_v42  ;;  %v170_v48 = vld [vmem:[#allocation7 + $0xf0] sm:$0xff]  ;;  %v175_v50 = vld [vmem:[#allocation7 + $0x118] sm:$0xff] }
  0x41   :  { %610 = vmatpush1.bf16.msra.mxu0 %v609_v19  ;;  %681 = vmatpush1.bf16.msra.mxu1 %v609_v19  ;;  %v627_v46 = vpack.c.bf16 %v171_v44, %v169_v43  ;;  %v173_v49 = vld [vmem:[#allocation7 + $0x108] sm:$0xff]  ;;  %v629_v51 = vpack.c.bf16 %v170_v48, %v168_v47  ;;  %v172_v53 = vld [vmem:[#allocation7 + $0x100] sm:$0xff]  ;;  %v174_v54 = vld [vmem:[#allocation7 + $0x110] sm:$0xff] }
  0x42   :  { %612 = vmatprep.subr.bf16.mxu0 %v611_v20  ;;  %666 = vmatprep.subr.bf16.mxu1 %v611_v20  ;;  %v631_v52 = vpack.c.bf16 %v175_v50, %v173_v49  ;;  %v177_v55 = vld [vmem:[#allocation7 + $0x128] sm:$0xff]  ;;  %v179_v56 = vld [vmem:[#allocation7 + $0x138] sm:$0xff]  ;;  %v633_v57 = vpack.c.bf16 %v174_v54, %v172_v53  ;;  %v176_v59 = vld [vmem:[#allocation7 + $0x120] sm:$0xff] }
  0x43   :  { %v635_v58 = vpack.c.bf16 %v179_v56, %v177_v55  ;;  %v178_v60 = vld [vmem:[#allocation7 + $0x130] sm:$0xff]  ;;  %v181_v61 = vld [vmem:[#allocation7 + $0x148] sm:$0xff]  ;;  %v183_v62 = vld [vmem:[#allocation7 + $0x158] sm:$0xff] }
  0x44   :  { %v637_v63 = vpack.c.bf16 %v178_v60, %v176_v59  ;;  %v639_v0 = vpack.c.bf16 %v183_v62, %v181_v61  ;;  %v180_v1 = vld [vmem:[#allocation7 + $0x140] sm:$0xff]  ;;  %v182_v2 = vld [vmem:[#allocation7 + $0x150] sm:$0xff]  ;;  %v185_v3 = vld [vmem:[#allocation7 + $0x168] sm:$0xff] }
  0x45   :  { %614 = vmatpush1.bf16.msra.mxu0 %v613_v25  ;;  %682 = vmatpush1.bf16.msra.mxu1 %v613_v25  ;;  %v187_v4 = vld [vmem:[#allocation7 + $0x178] sm:$0xff]  ;;  %v641_v5 = vpack.c.bf16 %v182_v2, %v180_v1  ;;  %v184_v7 = vld [vmem:[#allocation7 + $0x160] sm:$0xff]  ;;  %v186_v8 = vld [vmem:[#allocation7 + $0x170] sm:$0xff] }
  0x46   :  { %616 = vmatprep.subr.bf16.mxu0 %v615_v26  ;;  %667 = vmatprep.subr.bf16.mxu1 %v615_v26  ;;  %v643_v6 = vpack.c.bf16 %v187_v4, %v185_v3  ;;  %v189_v9 = vld [vmem:[#allocation7 + $0x188] sm:$0xff]  ;;  %v191_v10 = vld [vmem:[#allocation7 + $0x198] sm:$0xff]  ;;  %v645_v11 = vpack.c.bf16 %v186_v8, %v184_v7  ;;  %v188_v13 = vld [vmem:[#allocation7 + $0x180] sm:$0xff] }
  0x47   :  { %v647_v12 = vpack.c.bf16 %v191_v10, %v189_v9  ;;  %v190_v14 = vld [vmem:[#allocation7 + $0x190] sm:$0xff]  ;;  %v193_v15 = vld [vmem:[#allocation7 + $0x1a8] sm:$0xff]  ;;  %v195_v16 = vld [vmem:[#allocation7 + $0x1b8] sm:$0xff] }
  0x48   :  { %v649_v17 = vpack.c.bf16 %v190_v14, %v188_v13  ;;  %v651_v18 = vpack.c.bf16 %v195_v16, %v193_v15  ;;  %v192_v19 = vld [vmem:[#allocation7 + $0x1a0] sm:$0xff]  ;;  %v194_v20 = vld [vmem:[#allocation7 + $0x1b0] sm:$0xff]  ;;  %v197_v21 = vld [vmem:[#allocation7 + $0x1c8] sm:$0xff] }
  0x49   :  { %618 = vmatpush1.bf16.msra.mxu0 %v617_v31  ;;  %683 = vmatpush1.bf16.msra.mxu1 %v617_v31  ;;  %v199_v22 = vld [vmem:[#allocation7 + $0x1d8] sm:$0xff]  ;;  %v653_v23 = vpack.c.bf16 %v194_v20, %v192_v19  ;;  %v196_v25 = vld [vmem:[#allocation7 + $0x1c0] sm:$0xff]  ;;  %v198_v26 = vld [vmem:[#allocation7 + $0x1d0] sm:$0xff] }
  0x4a   :  { %620 = vmatprep.subr.bf16.mxu0 %v619_v32  ;;  %668 = vmatprep.subr.bf16.mxu1 %v619_v32  ;;  %v655_v24 = vpack.c.bf16 %v199_v22, %v197_v21  ;;  %v201_v27 = vld [vmem:[#allocation7 + $0x1e8] sm:$0xff]  ;;  %v203_v28 = vld [vmem:[#allocation7 + $0x1f8] sm:$0xff]  ;;  %v657_v29 = vpack.c.bf16 %v198_v26, %v196_v25  ;;  %v200_v31 = vld [vmem:[#allocation7 + $0x1e0] sm:$0xff] }
  0x4b   :  { %v659_v30 = vpack.c.bf16 %v203_v28, %v201_v27  ;;  %v202_v32 = vld [vmem:[#allocation7 + $0x1f0] sm:$0xff]  ;;  %v108_v34 = vld [vmem:[#allocation5] sm:$0xff]  ;;  %v111_v36 = vld [vmem:[#allocation5 + $0x18] sm:$0xff] }
  0x4c   :  { %v661_v33 = vpack.c.bf16 %v202_v32, %v200_v31  ;;  %v124_v35 = vld [vmem:[#allocation5 + $0x80] sm:$0xff]  ;;  %v110_v38 = vld [vmem:[#allocation5 + $0x10] sm:$0xff]  ;;  %v113_v40 = vld [vmem:[#allocation5 + $0x28] sm:$0xff] }
  0x4d   :  { %622 = vmatpush1.bf16.msra.mxu0 %v621_v37  ;;  %684 = vmatpush1.bf16.msra.mxu1 %v621_v37  ;;  %v127_v37 = vld [vmem:[#allocation5 + $0x98] sm:$0xff]  ;;  %v129_v41 = vld [vmem:[#allocation5 + $0xa8] sm:$0xff]  ;;  %v112_v42 = vld [vmem:[#allocation5 + $0x20] sm:$0xff] }
  0x4e   :  { %624 = vmatprep.subr.bf16.mxu0 %v623_v39  ;;  %669 = vmatprep.subr.bf16.mxu1 %v623_v39  ;;  %v126_v39 = vld [vmem:[#allocation5 + $0x90] sm:$0xff]  ;;  %v128_v43 = vld [vmem:[#allocation5 + $0xa0] sm:$0xff]  ;;  %v115_v44 = vld [vmem:[#allocation5 + $0x38] sm:$0xff] }
  0x4f   :  { %v130_v47 = vld [vmem:[#allocation5 + $0xb0] sm:$0xff]  ;;  %v117_v48 = vld [vmem:[#allocation5 + $0x48] sm:$0xff]  ;;  %v116_v50 = vld [vmem:[#allocation5 + $0x40] sm:$0xff] }
  0x50   :  { %v133_v49 = vld [vmem:[#allocation5 + $0xc8] sm:$0xff]  ;;  %v135_v53 = vld [vmem:[#allocation5 + $0xd8] sm:$0xff]  ;;  %v118_v54 = vld [vmem:[#allocation5 + $0x50] sm:$0xff] }
  0x51   :  { %626 = vmatpush1.bf16.msra.mxu0 %v625_v45  ;;  %685 = vmatpush1.bf16.msra.mxu1 %v625_v45  ;;  %v131_v45 = vld [vmem:[#allocation5 + $0xb8] sm:$0xff]  ;;  %v134_v55 = vld [vmem:[#allocation5 + $0xd0] sm:$0xff]  ;;  %v121_v56 = vld [vmem:[#allocation5 + $0x68] sm:$0xff] }
  0x52   :  { %628 = vmatprep.subr.bf16.mxu0 %v627_v46  ;;  %670 = vmatprep.subr.bf16.mxu1 %v627_v46  ;;  %v114_v46 = vld [vmem:[#allocation5 + $0x30] sm:$0xff]  ;;  %v136_v59 = vld [vmem:[#allocation5 + $0xe0] sm:$0xff]  ;;  %v123_v60 = vld [vmem:[#allocation5 + $0x78] sm:$0xff] }
  0x53   :  { %v139_v61 = vld [vmem:[#allocation5 + $0xf8] sm:$0xff]  ;;  %v122_v62 = vld [vmem:[#allocation5 + $0x70] sm:$0xff]  ;;  %v76_v1 = vld [vmem:[#allocation3] sm:$0xff] }
  0x54   :  { %v92_v2 = vld [vmem:[#allocation3 + $0x80] sm:$0xff]  ;;  %v77_v3 = vld [vmem:[#allocation3 + $0x8] sm:$0xff]  ;;  %v78_v13 = vld [vmem:[#allocation3 + $0x10] sm:$0xff] }
  0x55   :  { %630 = vmatpush1.bf16.msra.mxu0 %v629_v51  ;;  %686 = vmatpush1.bf16.msra.mxu1 %v629_v51  ;;  %v132_v51 = vld [vmem:[#allocation5 + $0xc0] sm:$0xff]  ;;  %v93_v4 = vld [vmem:[#allocation3 + $0x88] sm:$0xff]  ;;  %v94_v14 = vld [vmem:[#allocation3 + $0x90] sm:$0xff] }
  0x56   :  { %632 = vmatprep.subr.bf16.mxu0 %v631_v52  ;;  %671 = vmatprep.subr.bf16.mxu1 %v631_v52  ;;  %v119_v52 = vld [vmem:[#allocation5 + $0x58] sm:$0xff]  ;;  %v96_v31 = vld [vmem:[#allocation3 + $0xa0] sm:$0xff] }
  0x59   :  { %634 = vmatpush1.bf16.msra.mxu0 %v633_v57  ;;  %687 = vmatpush1.bf16.msra.mxu1 %v633_v57  ;;  %v137_v57 = vld [vmem:[#allocation5 + $0xe8] sm:$0xff] }
  0x5a   :  { %636 = vmatprep.subr.bf16.mxu0 %v635_v58  ;;  %672 = vmatprep.subr.bf16.mxu1 %v635_v58  ;;  %v120_v58 = vld [vmem:[#allocation5 + $0x60] sm:$0xff] }
  0x5d   :  { %638 = vmatpush1.bf16.msra.mxu0 %v637_v63  ;;  %688 = vmatpush1.bf16.msra.mxu1 %v637_v63  ;;  %v138_v63 = vld [vmem:[#allocation5 + $0xf0] sm:$0xff] }
  0x5e   :  { %640 = vmatprep.subr.bf16.mxu0 %v639_v0  ;;  %673 = vmatprep.subr.bf16.mxu1 %v639_v0  ;;  %v808_v0 = vmov 0.0  }
  0x5f   :  { %60 = vst.msk [vmem:[#allocation2] sm:$0xff] %vm59_vm0, %v808_v0  ;;  %61 = vst.msk [vmem:[#allocation2 + $0x8] sm:$0xff] %vm59_vm0, %v808_v0 }
  0x60   :  { %62 = vst.msk [vmem:[#allocation2 + $0x10] sm:$0xff] %vm59_vm0, %v808_v0  ;;  %63 = vst.msk [vmem:[#allocation2 + $0x18] sm:$0xff] %vm59_vm0, %v808_v0 }
  0x61   :  { %642 = vmatpush1.bf16.msra.mxu0 %v641_v5  ;;  %689 = vmatpush1.bf16.msra.mxu1 %v641_v5  ;;  %64 = vst.msk [vmem:[#allocation2 + $0x20] sm:$0xff] %vm59_vm0, %v808_v0  ;;  %65 = vst.msk [vmem:[#allocation2 + $0x28] sm:$0xff] %vm59_vm0, %v808_v0 }
  0x62   :  { %644 = vmatprep.subr.bf16.mxu0 %v643_v6  ;;  %674 = vmatprep.subr.bf16.mxu1 %v643_v6  ;;  %66 = vst.msk [vmem:[#allocation2 + $0x30] sm:$0xff] %vm59_vm0, %v808_v0  ;;  %67 = vst.msk [vmem:[#allocation2 + $0x38] sm:$0xff] %vm59_vm0, %v808_v0 }
  0x63   :  { %68 = vst.msk [vmem:[#allocation2 + $0x40] sm:$0xff] %vm59_vm0, %v808_v0  ;;  %69 = vst.msk [vmem:[#allocation2 + $0x48] sm:$0xff] %vm59_vm0, %v808_v0 }
  0x64   :  { %70 = vst.msk [vmem:[#allocation2 + $0x50] sm:$0xff] %vm59_vm0, %v808_v0  ;;  %71 = vst.msk [vmem:[#allocation2 + $0x58] sm:$0xff] %vm59_vm0, %v808_v0 }
  0x65   :  { %646 = vmatpush1.bf16.msra.mxu0 %v645_v11  ;;  %690 = vmatpush1.bf16.msra.mxu1 %v645_v11  ;;  %72 = vst.msk [vmem:[#allocation2 + $0x60] sm:$0xff] %vm59_vm0, %v808_v0  ;;  %73 = vst.msk [vmem:[#allocation2 + $0x68] sm:$0xff] %vm59_vm0, %v808_v0 }
  0x66   :  { %648 = vmatprep.subr.bf16.mxu0 %v647_v12  ;;  %675 = vmatprep.subr.bf16.mxu1 %v647_v12  ;;  %74 = vst.msk [vmem:[#allocation2 + $0x70] sm:$0xff] %vm59_vm0, %v808_v0  ;;  %75 = vst.msk [vmem:[#allocation2 + $0x78] sm:$0xff] %vm59_vm0, %v808_v0  ;;  %v84_v0 = vld [vmem:[#allocation3 + $0x40] sm:$0xff] }
  0x69   :  { %650 = vmatpush1.bf16.msra.mxu0 %v649_v17  ;;  %691 = vmatpush1.bf16.msra.mxu1 %v649_v17  ;;  %v79_v17 = vld [vmem:[#allocation3 + $0x18] sm:$0xff] }
  0x6a   :  { %652 = vmatprep.subr.bf16.mxu0 %v651_v18  ;;  %676 = vmatprep.subr.bf16.mxu1 %v651_v18  ;;  %v95_v18 = vld [vmem:[#allocation3 + $0x98] sm:$0xff] }
  0x6d   :  { %654 = vmatpush1.bf16.msra.mxu0 %v653_v23  ;;  %692 = vmatpush1.bf16.msra.mxu1 %v653_v23 }
  0x6e   :  { %656 = vmatprep.subr.bf16.mxu0 %v655_v24  ;;  %677 = vmatprep.subr.bf16.mxu1 %v655_v24 }
  0x71   :  { %658 = vmatpush1.bf16.msra.mxu0 %v657_v29  ;;  %693 = vmatpush1.bf16.msra.mxu1 %v657_v29  ;;  %v80_v29 = vld [vmem:[#allocation3 + $0x20] sm:$0xff] }
  0x72   :  { %660 = vmatprep.subr.bf16.mxu0 %v659_v30  ;;  %678 = vmatprep.subr.bf16.mxu1 %v659_v30 }
  0x75   :  { %662 = vmatpush1.bf16.msra.mxu0 %v661_v33  ;;  %694 = vmatpush1.bf16.msra.mxu1 %v661_v33 }
  0x78   :  { %269 = vmatmul.mubr.f32.vlgmr.msra.gmra.mrb[0].mxu0 %v108_v34  ;;  %317 = vmatmul.mubr.f32.vlgmr.msra.gmra.mrb[0].mxu1 %v124_v35  ;;  %v81_v35 = vld [vmem:[#allocation3 + $0x28] sm:$0xff] }
  0x79   :  { %274 = vmatprep.mubr.f32.mxu0 %v111_v36  ;;  %322 = vmatprep.mubr.f32.mxu1 %v127_v37  ;;  %v97_v36 = vld [vmem:[#allocation3 + $0xa8] sm:$0xff] }
  0x7c   :  { %275 = vmatmul.mubr.f32.gmra.mrb[2].mxu0 %v110_v38  ;;  %323 = vmatmul.mubr.f32.gmra.mrb[2].mxu1 %v126_v39 }
  0x7d   :  { %280 = vmatprep.mubr.f32.mxu0 %v113_v40  ;;  %328 = vmatprep.mubr.f32.mxu1 %v129_v41 }
  0x80   :  { %281 = vmatmul.mubr.f32.gmra.mrb[4].mxu0 %v112_v42  ;;  %329 = vmatmul.mubr.f32.gmra.mrb[4].mxu1 %v128_v43 }
  0x81   :  { %286 = vmatprep.mubr.f32.mxu0 %v115_v44  ;;  %334 = vmatprep.mubr.f32.mxu1 %v131_v45 }
  0x84   :  { %287 = vmatmul.mubr.f32.gmra.mrb[6].mxu0 %v114_v46  ;;  %335 = vmatmul.mubr.f32.gmra.mrb[6].mxu1 %v130_v47  ;;  %v82_v46 = vld [vmem:[#allocation3 + $0x30] sm:$0xff] }
  0x85   :  { %292 = vmatprep.mubr.f32.mxu0 %v117_v48  ;;  %340 = vmatprep.mubr.f32.mxu1 %v133_v49  ;;  %v98_v49 = vld [vmem:[#allocation3 + $0xb0] sm:$0xff] }
  0x88   :  { %293 = vmatmul.mubr.f32.gmra.mrb[8].mxu0 %v116_v50  ;;  %341 = vmatmul.mubr.f32.gmra.mrb[8].mxu1 %v132_v51 }
  0x89   :  { %298 = vmatprep.mubr.f32.mxu0 %v119_v52  ;;  %346 = vmatprep.mubr.f32.mxu1 %v135_v53  ;;  %v83_v53 = vld [vmem:[#allocation3 + $0x38] sm:$0xff] }
  0x8c   :  { %299 = vmatmul.mubr.f32.gmra.mrb[10].mxu0 %v118_v54  ;;  %347 = vmatmul.mubr.f32.gmra.mrb[10].mxu1 %v134_v55  ;;  %v99_v54 = vld [vmem:[#allocation3 + $0xb8] sm:$0xff] }
  0x8d   :  { %304 = vmatprep.mubr.f32.mxu0 %v121_v56  ;;  %352 = vmatprep.mubr.f32.mxu1 %v137_v57 }
  0x90   :  { %305 = vmatmul.mubr.f32.gmra.mrb[12].mxu0 %v120_v58  ;;  %353 = vmatmul.mubr.f32.gmra.mrb[12].mxu1 %v136_v59 }
  0x91   :  { %310 = vmatprep.mubr.f32.mxu0 %v123_v60  ;;  %358 = vmatprep.mubr.f32.mxu1 %v139_v61 }
  0x94   :  { %311 = vmatmul.mubr.f32.gmra.mrb[14].mxu0 %v122_v62  ;;  %359 = vmatmul.mubr.f32.gmra.mrb[14].mxu1 %v138_v63 }
 0x14b   :  { %v270_v5 = vpop.f32.mrb[0].mxu0  ;;  %v318_v6 = vpop.f32.mrb[0].mxu1 }
 0x14c   :  { %v365_v7 = vadd.f32 %v270_v5, %v76_v1  ;;  %v381_v8 = vadd.f32 %v318_v6, %v92_v2  ;;  %v272_v9 = vpop.f32.mrb[1].mxu0  ;;  %v320_v10 = vpop.f32.mrb[1].mxu1 }
 0x14d   :  { %v366_v11 = vadd.f32 %v272_v9, %v77_v3  ;;  %v382_v12 = vadd.f32 %v320_v10, %v93_v4  ;;  %v100_v3 = vld [vmem:[#allocation3 + $0xc0] sm:$0xff] }
 0x14e   :  { %v413_v15 = vmul.f32 %v365_v7, %v365_v7  ;;  %v429_v16 = vmul.f32 %v381_v8, %v381_v8  ;;  %v85_v7 = vld [vmem:[#allocation3 + $0x48] sm:$0xff] }
 0x14f   :  { %v414_v19 = vmul.f32 %v366_v11, %v366_v11  ;;  %v430_v20 = vmul.f32 %v382_v12, %v382_v12  ;;  %v276_v21 = vpop.f32.mrb[2].mxu0  ;;  %v324_v22 = vpop.f32.mrb[2].mxu1  ;;  %v101_v8 = vld [vmem:[#allocation3 + $0xc8] sm:$0xff] }
 0x150   :  { %v367_v23 = vadd.f32 %v276_v21, %v78_v13  ;;  %v383_v24 = vadd.f32 %v324_v22, %v94_v14  ;;  %v278_v25 = vpop.f32.mrb[3].mxu0  ;;  %v326_v26 = vpop.f32.mrb[3].mxu1  ;;  %v102_v21 = vld [vmem:[#allocation3 + $0xd0] sm:$0xff] }
 0x151   :  { %v368_v27 = vadd.f32 %v278_v25, %v79_v17  ;;  %v384_v28 = vadd.f32 %v326_v26, %v95_v18  ;;  %v445_v30 = vadd.f32 %v414_v19, %v413_v15  ;;  %v469_v32 = vadd.f32 %v430_v20, %v429_v16  ;;  %v86_v18 = vld [vmem:[#allocation3 + $0x50] sm:$0xff]  ;;  %v87_v25 = vld [vmem:[#allocation3 + $0x58] sm:$0xff] }
 0x152   :  { %v415_v33 = vmul.f32 %v367_v23, %v367_v23  ;;  %v431_v34 = vmul.f32 %v383_v24, %v383_v24  ;;  %v103_v26 = vld [vmem:[#allocation3 + $0xd8] sm:$0xff] }
 0x153   :  { %v416_v37 = vmul.f32 %v368_v27, %v368_v27  ;;  %v432_v38 = vmul.f32 %v384_v28, %v384_v28  ;;  %v282_v39 = vpop.f32.mrb[4].mxu0  ;;  %446 = vadd.xlane.f32.xlu0 %v445_v30  ;;  %v330_v40 = vpop.f32.mrb[4].mxu1 }
 0x154   :  { %v369_v41 = vadd.f32 %v282_v39, %v80_v29  ;;  %v284_v42 = vpop.f32.mrb[5].mxu0  ;;  %v385_v43 = vadd.f32 %v330_v40, %v96_v31  ;;  %v332_v44 = vpop.f32.mrb[5].mxu1  ;;  %v104_v39 = vld [vmem:[#allocation3 + $0xe0] sm:$0xff] }
 0x155   :  { %v370_v45 = vadd.f32 %v284_v42, %v81_v35  ;;  %v386_v47 = vadd.f32 %v332_v44, %v97_v36  ;;  %v472_v48 = vadd.f32 %v432_v38, %v431_v34  ;;  %v448_v50 = vadd.f32 %v416_v37, %v415_v33  ;;  %v88_v36 = vld [vmem:[#allocation3 + $0x60] sm:$0xff]  ;;  %v105_v44 = vld [vmem:[#allocation3 + $0xe8] sm:$0xff] }
 0x156   :  { %v417_v51 = vmul.f32 %v369_v41, %v369_v41  ;;  %v433_v52 = vmul.f32 %v385_v43, %v385_v43  ;;  %v89_v43 = vld [vmem:[#allocation3 + $0x68] sm:$0xff] }
 0x157   :  { %v418_v55 = vmul.f32 %v370_v45, %v370_v45  ;;  %v288_v56 = vpop.f32.mrb[6].mxu0  ;;  %v434_v57 = vmul.f32 %v386_v47, %v386_v47  ;;  %473 = vadd.xlane.f32.xlu1 %v472_v48  ;;  %470 = vadd.xlane.f32.xlu0 %v469_v32  ;;  %v336_v58 = vpop.f32.mrb[6].mxu1 }
 0x158   :  { %v371_v59 = vadd.f32 %v288_v56, %v82_v46  ;;  %v290_v60 = vpop.f32.mrb[7].mxu0  ;;  %v387_v61 = vadd.f32 %v336_v58, %v98_v49  ;;  %v338_v62 = vpop.f32.mrb[7].mxu1 }
 0x159   :  { %v372_v63 = vadd.f32 %v290_v60, %v83_v53  ;;  %v388_v1 = vadd.f32 %v338_v62, %v99_v54  ;;  %v451_v2 = vadd.f32 %v418_v55, %v417_v51  ;;  %v475_v4 = vadd.f32 %v434_v57, %v433_v52  ;;  %v90_v54 = vld [vmem:[#allocation3 + $0x70] sm:$0xff]  ;;  %v107_v62 = vld [vmem:[#allocation3 + $0xf8] sm:$0xff] }
 0x15a   :  { %v419_v5 = vmul.f32 %v371_v59, %v371_v59  ;;  %v435_v6 = vmul.f32 %v387_v61, %v387_v61  ;;  %v106_v57 = vld [vmem:[#allocation3 + $0xf0] sm:$0xff]  ;;  %v91_v61 = vld [vmem:[#allocation3 + $0x78] sm:$0xff] }
 0x15b   :  { %v420_v9 = vmul.f32 %v372_v63, %v372_v63  ;;  %v294_v10 = vpop.f32.mrb[8].mxu0  ;;  %v436_v11 = vmul.f32 %v388_v1, %v388_v1  ;;  %452 = vadd.xlane.f32.xlu1 %v451_v2  ;;  %449 = vadd.xlane.f32.xlu0 %v448_v50  ;;  %v342_v12 = vpop.f32.mrb[8].mxu1 }
 0x15c   :  { %v373_v13 = vadd.f32 %v294_v10, %v84_v0  ;;  %v296_v14 = vpop.f32.mrb[9].mxu0  ;;  %v389_v15 = vadd.f32 %v342_v12, %v100_v3  ;;  %v344_v16 = vpop.f32.mrb[9].mxu1 }
 0x15d   :  { %v374_v17 = vadd.f32 %v296_v14, %v85_v7  ;;  %v390_v19 = vadd.f32 %v344_v16, %v101_v8  ;;  %v454_v20 = vadd.f32 %v420_v9, %v419_v5  ;;  %v478_v22 = vadd.f32 %v436_v11, %v435_v6 }
 0x15e   :  { %v421_v23 = vmul.f32 %v373_v13, %v373_v13  ;;  %v437_v24 = vmul.f32 %v389_v15, %v389_v15 }
 0x15f   :  { %v422_v27 = vmul.f32 %v374_v17, %v374_v17  ;;  %v300_v28 = vpop.f32.mrb[10].mxu0  ;;  %v438_v29 = vmul.f32 %v390_v19, %v390_v19  ;;  %455 = vadd.xlane.f32.xlu1 %v454_v20  ;;  %476 = vadd.xlane.f32.xlu0 %v475_v4  ;;  %v348_v30 = vpop.f32.mrb[10].mxu1  ;;  %v397_v17 = vld [vmem:[#allocation2] sm:$0xff]  ;;  %v406_v20 = vld [vmem:[#allocation2 + $0x48] sm:$0xff] }
 0x160   :  { %v375_v31 = vadd.f32 %v300_v28, %v86_v18  ;;  %v302_v32 = vpop.f32.mrb[11].mxu0  ;;  %v391_v33 = vadd.f32 %v348_v30, %v102_v21  ;;  %v350_v34 = vpop.f32.mrb[11].mxu1  ;;  %v405_v21 = vld [vmem:[#allocation2 + $0x40] sm:$0xff] }
 0x161   :  { %v376_v35 = vadd.f32 %v302_v32, %v87_v25  ;;  %v392_v37 = vadd.f32 %v350_v34, %v103_v26  ;;  %v457_v38 = vadd.f32 %v422_v27, %v421_v23  ;;  %v481_v40 = vadd.f32 %v438_v29, %v437_v24  ;;  %v399_v26 = vld [vmem:[#allocation2 + $0x10] sm:$0xff]  ;;  %v398_v27 = vld [vmem:[#allocation2 + $0x8] sm:$0xff] }
 0x162   :  { %v423_v41 = vmul.f32 %v375_v31, %v375_v31  ;;  %v439_v42 = vmul.f32 %v391_v33, %v391_v33  ;;  %v400_v33 = vld [vmem:[#allocation2 + $0x18] sm:$0xff]  ;;  %v407_v34 = vld [vmem:[#allocation2 + $0x50] sm:$0xff] }
 0x163   :  { %v424_v45 = vmul.f32 %v376_v35, %v376_v35  ;;  %v306_v46 = vpop.f32.mrb[12].mxu0  ;;  %v440_v47 = vmul.f32 %v392_v37, %v392_v37  ;;  %479 = vadd.xlane.f32.xlu1 %v478_v22  ;;  %458 = vadd.xlane.f32.xlu0 %v457_v38  ;;  %v354_v48 = vpop.f32.mrb[12].mxu1 }
 0x164   :  { %v377_v49 = vadd.f32 %v306_v46, %v88_v36  ;;  %v308_v50 = vpop.f32.mrb[13].mxu0  ;;  %v393_v51 = vadd.f32 %v354_v48, %v104_v39  ;;  %v356_v52 = vpop.f32.mrb[13].mxu1 }
 0x165   :  { %v378_v53 = vadd.f32 %v308_v50, %v89_v43  ;;  %v394_v55 = vadd.f32 %v356_v52, %v105_v44  ;;  %v460_v56 = vadd.f32 %v424_v45, %v423_v41  ;;  %v484_v58 = vadd.f32 %v440_v47, %v439_v42  ;;  %v401_v43 = vld [vmem:[#allocation2 + $0x20] sm:$0xff]  ;;  %v402_v50 = vld [vmem:[#allocation2 + $0x28] sm:$0xff] }
 0x166   :  { %v425_v59 = vmul.f32 %v377_v49, %v377_v49  ;;  %v441_v60 = vmul.f32 %v393_v51, %v393_v51 }
 0x167   :  { %v426_v63 = vmul.f32 %v378_v53, %v378_v53  ;;  %v312_v0 = vpop.f32.mrb[14].mxu0  ;;  %v442_v1 = vmul.f32 %v394_v55, %v394_v55  ;;  %461 = vadd.xlane.f32.xlu1 %v460_v56  ;;  %482 = vadd.xlane.f32.xlu0 %v481_v40  ;;  %v360_v2 = vpop.f32.mrb[14].mxu1  ;;  %v408_v40 = vld [vmem:[#allocation2 + $0x58] sm:$0xff]  ;;  %v409_v53 = vld [vmem:[#allocation2 + $0x60] sm:$0xff] }
 0x168   :  { %v379_v3 = vadd.f32 %v312_v0, %v90_v54  ;;  %v314_v4 = vpop.f32.mrb[15].mxu0  ;;  %v395_v5 = vadd.f32 %v360_v2, %v106_v57  ;;  %v362_v6 = vpop.f32.mrb[15].mxu1 }
 0x169   :  { %v380_v7 = vadd.f32 %v314_v4, %v91_v61  ;;  %v396_v8 = vadd.f32 %v362_v6, %v107_v62  ;;  %v463_v9 = vadd.f32 %v426_v63, %v425_v59  ;;  %v487_v10 = vadd.f32 %v442_v1, %v441_v60  ;;  %v410_v60 = vld [vmem:[#allocation2 + $0x68] sm:$0xff]  ;;  %v403_v63 = vld [vmem:[#allocation2 + $0x30] sm:$0xff] }
 0x16a   :  { %v427_v11 = vmul.f32 %v379_v3, %v379_v3  ;;  %v443_v12 = vmul.f32 %v395_v5, %v395_v5 }
 0x16b   :  { %v428_v13 = vmul.f32 %v380_v7, %v380_v7  ;;  %v444_v14 = vmul.f32 %v396_v8, %v396_v8  ;;  %485 = vadd.xlane.f32.xlu1 %v484_v58  ;;  %464 = vadd.xlane.f32.xlu0 %v463_v9  ;;  %v404_v7 = vld [vmem:[#allocation2 + $0x38] sm:$0xff] }
 0x16d   :  { %v466_v15 = vadd.f32 %v428_v13, %v427_v11  ;;  %v490_v16 = vadd.f32 %v444_v14, %v443_v12 }
 0x16f   :  { %467 = vadd.xlane.f32.xlu1 %v466_v15  ;;  %488 = vadd.xlane.f32.xlu0 %v487_v10  ;;  %v411_v10 = vld [vmem:[#allocation2 + $0x70] sm:$0xff] }
 0x173   :  { %491 = vadd.xlane.f32.xlu1 %v490_v16 }
 0x1e0   :  { %v447_v18 = vpop.xlane.xlu0 %446 }
 0x1e1   :  { %v493_v19 = vadd.f32 %v447_v18, %v397_v17 }
 0x1e3   :  { %510 = vst.msk [vmem:[#allocation2] sm:$0xff] %vm59_vm0, %v493_v19 }
 0x1e4   :  { %v474_v22 = vpop.xlane.xlu1 %473  ;;  %v471_v23 = vpop.xlane.xlu0 %470 }
 0x1e5   :  { %v502_v24 = vadd.f32 %v474_v22, %v406_v20  ;;  %v501_v25 = vadd.f32 %v471_v23, %v405_v21  ;;  %v412_v21 = vld [vmem:[#allocation2 + $0x78] sm:$0xff] }
 0x1e7   :  { %519 = vst.msk [vmem:[#allocation2 + $0x48] sm:$0xff] %vm59_vm0, %v502_v24  ;;  %518 = vst.msk [vmem:[#allocation2 + $0x40] sm:$0xff] %vm59_vm0, %v501_v25 }
 0x1e8   :  { %v453_v28 = vpop.xlane.xlu1 %452  ;;  %v450_v29 = vpop.xlane.xlu0 %449 }
 0x1e9   :  { %v495_v30 = vadd.f32 %v453_v28, %v399_v26  ;;  %v494_v31 = vadd.f32 %v450_v29, %v398_v27 }
 0x1ea   :  { %v529_v32 = vld [vmem:[#allocation2] sm:$0xff] }
 0x1eb   :  { %v545_v35 = vmax.f32 %v529_v32, 1e-24  ;;  %512 = vst.msk [vmem:[#allocation2 + $0x10] sm:$0xff] %vm59_vm0, %v495_v30  ;;  %511 = vst.msk [vmem:[#allocation2 + $0x8] sm:$0xff] %vm59_vm0, %v494_v31 }
 0x1ec   :  { %v456_v36 = vpop.xlane.xlu1 %455  ;;  %v477_v37 = vpop.xlane.xlu0 %476 }
 0x1ed   :  { %701 = vrsqrt.f32 %v545_v35  ;;  %v496_v38 = vadd.f32 %v456_v36, %v400_v33  ;;  %v503_v39 = vadd.f32 %v477_v37, %v407_v34 }
 0x1ee   :  { %v538_v41 = vld [vmem:[#allocation2 + $0x48] sm:$0xff]  ;;  %v537_v42 = vld [vmem:[#allocation2 + $0x40] sm:$0xff] }
 0x1ef   :  { %v554_v44 = vmax.f32 %v538_v41, 1e-24  ;;  %v553_v45 = vmax.f32 %v537_v42, 1e-24  ;;  %513 = vst.msk [vmem:[#allocation2 + $0x18] sm:$0xff] %vm59_vm0, %v496_v38  ;;  %520 = vst.msk [vmem:[#allocation2 + $0x50] sm:$0xff] %vm59_vm0, %v503_v39 }
 0x1f0   :  { %v480_v46 = vpop.xlane.xlu1 %479  ;;  %v459_v47 = vpop.xlane.xlu0 %458 }
 0x1f1   :  { %703 = vrsqrt.f32 %v554_v44  ;;  %v504_v48 = vadd.f32 %v480_v46, %v408_v40  ;;  %v497_v49 = vadd.f32 %v459_v47, %v401_v43 }
 0x1f2   :  { %705 = vrsqrt.f32 %v553_v45  ;;  %v531_v51 = vld [vmem:[#allocation2 + $0x10] sm:$0xff]  ;;  %v530_v52 = vld [vmem:[#allocation2 + $0x8] sm:$0xff] }
 0x1f3   :  { %v547_v54 = vmax.f32 %v531_v51, 1e-24  ;;  %v546_v55 = vmax.f32 %v530_v52, 1e-24  ;;  %521 = vst.msk [vmem:[#allocation2 + $0x58] sm:$0xff] %vm59_vm0, %v504_v48  ;;  %514 = vst.msk [vmem:[#allocation2 + $0x20] sm:$0xff] %vm59_vm0, %v497_v49 }
 0x1f4   :  { %v462_v56 = vpop.xlane.xlu1 %461  ;;  %v483_v57 = vpop.xlane.xlu0 %482 }
 0x1f5   :  { %707 = vrsqrt.f32 %v547_v54  ;;  %v498_v58 = vadd.f32 %v462_v56, %v402_v50  ;;  %v505_v59 = vadd.f32 %v483_v57, %v409_v53 }
 0x1f6   :  { %709 = vrsqrt.f32 %v546_v55  ;;  %v532_v61 = vld [vmem:[#allocation2 + $0x18] sm:$0xff]  ;;  %v539_v62 = vld [vmem:[#allocation2 + $0x50] sm:$0xff] }
 0x1f7   :  { %v702_v0 = vpop.eup %701  ;;  %v548_v1 = vmax.f32 %v532_v61, 1e-24  ;;  %v555_v2 = vmax.f32 %v539_v62, 1e-24  ;;  %515 = vst.msk [vmem:[#allocation2 + $0x28] sm:$0xff] %vm59_vm0, %v498_v58  ;;  %522 = vst.msk [vmem:[#allocation2 + $0x60] sm:$0xff] %vm59_vm0, %v505_v59 }
 0x1f8   :  { %577 = vst.msk [vmem:[%s980_s3] sm:$0xff] %vm59_vm0, %v702_v0  ;;  %v486_v3 = vpop.xlane.xlu1 %485  ;;  %v465_v4 = vpop.xlane.xlu0 %464 }
 0x1f9   :  { %711 = vrsqrt.f32 %v548_v1  ;;  %v506_v5 = vadd.f32 %v486_v3, %v410_v60  ;;  %v499_v6 = vadd.f32 %v465_v4, %v403_v63 }
 0x1fa   :  { %713 = vrsqrt.f32 %v555_v2  ;;  %v540_v8 = vld [vmem:[#allocation2 + $0x58] sm:$0xff]  ;;  %v533_v9 = vld [vmem:[#allocation2 + $0x20] sm:$0xff] }
 0x1fb   :  { %v704_v11 = vpop.eup %703  ;;  %v556_v12 = vmax.f32 %v540_v8, 1e-24  ;;  %v549_v13 = vmax.f32 %v533_v9, 1e-24  ;;  %523 = vst.msk [vmem:[#allocation2 + $0x68] sm:$0xff] %vm59_vm0, %v506_v5  ;;  %516 = vst.msk [vmem:[#allocation2 + $0x30] sm:$0xff] %vm59_vm0, %v499_v6 }
 0x1fc   :  { %v706_v14 = vpop.eup %705  ;;  %586 = vst.msk [vmem:[%s980_s3 + $0x48] sm:$0xff] %vm59_vm0, %v704_v11  ;;  %v468_v15 = vpop.xlane.xlu1 %467 }
 0x1fd   :  { %v489_v16 = vpop.xlane.xlu0 %488  ;;  %585 = vst.msk [vmem:[%s980_s3 + $0x40] sm:$0xff] %vm59_vm0, %v706_v14  ;;  %715 = vrsqrt.f32 %v556_v12  ;;  %v500_v17 = vadd.f32 %v468_v15, %v404_v7 }
 0x1fe   :  { %v507_v18 = vadd.f32 %v489_v16, %v411_v10  ;;  %717 = vrsqrt.f32 %v549_v13  ;;  %v534_v19 = vld [vmem:[#allocation2 + $0x28] sm:$0xff]  ;;  %v541_v20 = vld [vmem:[#allocation2 + $0x60] sm:$0xff] }
 0x1ff   :  { %v708_v22 = vpop.eup %707  ;;  %v550_v23 = vmax.f32 %v534_v19, 1e-24  ;;  %v557_v24 = vmax.f32 %v541_v20, 1e-24  ;;  %517 = vst.msk [vmem:[#allocation2 + $0x38] sm:$0xff] %vm59_vm0, %v500_v17 }
 0x200   :  { %524 = vst.msk [vmem:[#allocation2 + $0x70] sm:$0xff] %vm59_vm0, %v507_v18  ;;  %v710_v25 = vpop.eup %709  ;;  %579 = vst.msk [vmem:[%s980_s3 + $0x10] sm:$0xff] %vm59_vm0, %v708_v22  ;;  %v492_v26 = vpop.xlane.xlu1 %491 }
 0x201   :  { %578 = vst.msk [vmem:[%s980_s3 + $0x8] sm:$0xff] %vm59_vm0, %v710_v25  ;;  %719 = vrsqrt.f32 %v550_v23  ;;  %v508_v27 = vadd.f32 %v492_v26, %v412_v21 }
 0x202   :  { %721 = vrsqrt.f32 %v557_v24  ;;  %v542_v28 = vld [vmem:[#allocation2 + $0x68] sm:$0xff]  ;;  %v535_v29 = vld [vmem:[#allocation2 + $0x30] sm:$0xff] }
 0x203   :  { %v712_v30 = vpop.eup %711  ;;  %v558_v31 = vmax.f32 %v542_v28, 1e-24  ;;  %v551_v32 = vmax.f32 %v535_v29, 1e-24  ;;  %525 = vst.msk [vmem:[#allocation2 + $0x78] sm:$0xff] %vm59_vm0, %v508_v27 }
 0x204   :  { %v714_v33 = vpop.eup %713  ;;  %580 = vst.msk [vmem:[%s980_s3 + $0x18] sm:$0xff] %vm59_vm0, %v712_v30 }
 0x205   :  { %587 = vst.msk [vmem:[%s980_s3 + $0x50] sm:$0xff] %vm59_vm0, %v714_v33  ;;  %723 = vrsqrt.f32 %v558_v31 }
 0x206   :  { %725 = vrsqrt.f32 %v551_v32  ;;  %v536_v34 = vld [vmem:[#allocation2 + $0x38] sm:$0xff] }
 0x207   :  { %v543_v35 = vld [vmem:[#allocation2 + $0x70] sm:$0xff]  ;;  %v716_v36 = vpop.eup %715  ;;  %v552_v37 = vmax.f32 %v536_v34, 1e-24 }
 0x208   :  { %v559_v38 = vmax.f32 %v543_v35, 1e-24  ;;  %v718_v39 = vpop.eup %717  ;;  %588 = vst.msk [vmem:[%s980_s3 + $0x58] sm:$0xff] %vm59_vm0, %v716_v36 }
 0x209   :  { %581 = vst.msk [vmem:[%s980_s3 + $0x20] sm:$0xff] %vm59_vm0, %v718_v39  ;;  %727 = vrsqrt.f32 %v552_v37 }
 0x20a   :  { %729 = vrsqrt.f32 %v559_v38  ;;  %v544_v40 = vld [vmem:[#allocation2 + $0x78] sm:$0xff] }
 0x20b   :  { %v720_v41 = vpop.eup %719  ;;  %v560_v42 = vmax.f32 %v544_v40, 1e-24 }
 0x20c   :  { %v722_v43 = vpop.eup %721  ;;  %582 = vst.msk [vmem:[%s980_s3 + $0x28] sm:$0xff] %vm59_vm0, %v720_v41 }
 0x20d   :  { %589 = vst.msk [vmem:[%s980_s3 + $0x60] sm:$0xff] %vm59_vm0, %v722_v43  ;;  %731 = vrsqrt.f32 %v560_v42 }
 0x20f   :  { %v724_v44 = vpop.eup %723 }
 0x210   :  { %v726_v45 = vpop.eup %725  ;;  %590 = vst.msk [vmem:[%s980_s3 + $0x68] sm:$0xff] %vm59_vm0, %v724_v44 }
 0x211   :  { %583 = vst.msk [vmem:[%s980_s3 + $0x30] sm:$0xff] %vm59_vm0, %v726_v45 }
 0x213   :  { %v728_v46 = vpop.eup %727 }
 0x214   :  { %v730_v47 = vpop.eup %729  ;;  %584 = vst.msk [vmem:[%s980_s3 + $0x38] sm:$0xff] %vm59_vm0, %v728_v46 }
 0x215   :  { %591 = vst.msk [vmem:[%s980_s3 + $0x70] sm:$0xff] %vm59_vm0, %v730_v47 }
 0x217   :  { %v732_v48 = vpop.eup %731 }
 0x218   :  { %592 = vst.msk [vmem:[%s980_s3 + $0x78] sm:$0xff] %vm59_vm0, %v732_v48 }
 0x219   :  { %597 = vsyncpa [#allocation4], 1 }
 0x21a   :  { %598 = vsyncpa [#allocation6], 1 }

</bundles_post_ra>
